<compile_context>
chip_gen: v7x
topology: tpu7x:2x2x1
jax: 0.10.0
libtpu: 0.0.40
codegen_flags: <defaults>
</compile_context>

<pallas_src>
import numpy as np
import jax
import jax.numpy as jnp
from jax.experimental import pallas as pl
from jax.experimental.pallas import tpu as pltpu


# ----------------------------------------------------------------------------
# Glue: interpolation matrix (shape-dependent only, built once per shape)
# ----------------------------------------------------------------------------
def bilinear_matrix(n_out, n_in):
    """A (n_out, n_in) such that out = A @ in is bilinear resize, align_corners=True."""
    A = np.zeros((n_out, n_in), dtype=np.float32)
    if n_out == 1 or n_in == 1:
        A[:, 0] = 1.0
        return A
    scale = (n_in - 1) / (n_out - 1)
    for i in range(n_out):
        src = i * scale
        p0 = min(int(np.floor(src)), n_in - 1)
        p1 = min(p0 + 1, n_in - 1)
        frac = src - p0
        A[i, p0] += 1.0 - frac
        A[i, p1] += frac
    return A


# ----------------------------------------------------------------------------
# Kernel 1: bilinear x2 upsample; batch folded into the matmul M dimension
# ----------------------------------------------------------------------------
def _upsample_kernel(x_ref, ahb_ref, bw_ref, o_ref):
    # (B*Hu, B*Hi) @ (B*Hi, Wi*C) -> (B*Hu, Wi*C)   (H direction, all batches at once)
    xh = jnp.dot(ahb_ref[...], x_ref[...], preferred_element_type=jnp.float32)
    # (B*Hu, Wi*C) @ (Wi*C, Wu*C) -> (B*Hu, Wu*C)   (W direction)
    xu = jnp.dot(xh.astype(bw_ref.dtype), bw_ref[...],
                 preferred_element_type=jnp.float32)
    o_ref[...] = xu.astype(o_ref.dtype)


# ----------------------------------------------------------------------------
# Wrapper
# ----------------------------------------------------------------------------
def expanding_block_pallas(x, cc, w1, b1, w2, b2, w3, b3,
                           compute_dtype=jnp.bfloat16):
    B, C, Hi, Wi = x.shape
    Ch = C // 2
    Hu, Wu = 2 * Hi, 2 * Wi
    H2, W2 = Hu - 4, Wu - 4
    assert C % 2 == 0
    assert H2 > 0 and W2 > 0, "input too small for two VALID 3x3 convs"
    assert cc.shape[1] == Ch, "skip connection must carry in_channels // 2 channels"

    # crop window, exactly as the module computes it (same indices used for H and W)
    lo = cc.shape[2] // 2 - Hu // 2
    hi = lo + Hu
    assert 0 <= lo and hi <= cc.shape[2] and hi <= cc.shape[3], "crop out of bounds"

    # --- wrapper-side layout glue: one fused crop+transpose+reshape per input
    x2d = (jnp.transpose(x, (0, 2, 3, 1))
              .reshape(B * Hi, Wi * C).astype(compute_dtype))            # (B*Hi, Wi*C)
    cc_pix = (jnp.transpose(cc[:, :, lo:hi, lo:hi], (0, 2, 3, 1))
                 .reshape(B * Hu * Wu, Ch).astype(compute_dtype))        # (B*Hu*Wu, Ch)

    # --- static interpolation matrices (numpy, shape-dependent only)
    AH = bilinear_matrix(Hu, Hi)
    AW = bilinear_matrix(Wu, Wi)
    ahb = jnp.asarray(np.kron(np.eye(B, dtype=np.float32), AH), dtype=compute_dtype)
    bw = jnp.asarray(np.kron(AW.T, np.eye(C, dtype=np.float32)), dtype=compute_dtype)

    # --- conv weights repacked for im2col matmuls (rows = (dy, dx, cin), cols = cout)
    w3m = jnp.transpose(w3[:, :, 0, 0], (1, 0)).astype(compute_dtype)              # (C, Ch)
    w1m = jnp.transpose(w1, (2, 3, 1, 0)).reshape(9 * C, Ch).astype(compute_dtype)  # (9C, Ch)
    w2m = jnp.transpose(w2, (2, 3, 1, 0)).reshape(9 * Ch, Ch).astype(compute_dtype)  # (9Ch, Ch)
    b3r = b3.reshape(1, Ch).astype(jnp.float32)
    b1r = b1.reshape(1, Ch).astype(jnp.float32)
    b2r = b2.reshape(1, Ch).astype(jnp.float32)

    # ---------------- kernel 1: bilinear x2 upsample ----------------
    xu2d = pl.pallas_call(
        _upsample_kernel,
        out_shape=jax.ShapeDtypeStruct((B * Hu, Wu * C), compute_dtype),
    )(x2d, ahb, bw)
    # lane-major (w, c) -> pixel rows (b*Hu*Wu, c); pure reshape of contiguous data
    xu_pix = xu2d.reshape(B * Hu * Wu, C)

    # ---------------- kernel 2: conv3 + concat + conv1 + conv2 ----------------
    npix = Hu * Wu                 # pixels per batch element == rows per grid block
    M1 = npix - 2 * Wu - 2         # rows holding conv1 results (incl. a few edge rows)
    M2 = M1 - 2 * Wu - 2           # rows holding conv2 results
    taps = [(dy, dx) for dy in range(3) for dx in range(3)]

    def conv_kernel(xu_ref, cc_ref, w3_ref, b3_ref, w1_ref, b1_ref,
                    w2_ref, b2_ref, o_ref, z_s, p1_s, h1_s, p2_s):
        f32 = jnp.float32
        # conv3 (1x1): exact channels-only matmul, M = Hu*Wu
        y3 = jnp.dot(xu_ref[...], w3_ref[...], preferred_element_type=f32)
        y3 = y3 + b3_ref[...]
        # torch.cat((cropped_cc, conv3_out), dim=channel), staged in VMEM scratch
        z_s[:, 0:Ch] = cc_ref[...]
        z_s[:, Ch:C] = y3.astype(z_s.dtype)

        # conv1 (3x3 VALID) via im2col: 9 shifted copies, then ONE matmul (K = 9*C)
        for t, (dy, dx) in enumerate(taps):
            off = dy * Wu + dx
            p1_s[:, t * C:(t + 1) * C] = z_s[off:off + M1, :]
        h1 = jnp.dot(p1_s[...], w1_ref[...], preferred_element_type=f32)
        h1 = jnp.maximum(h1 + b1_ref[...], 0.0)
        h1_s[...] = h1.astype(h1_s.dtype)

        # conv2 (3x3 VALID) via im2col: ONE matmul (K = 9*Ch)
        for t, (dy, dx) in enumerate(taps):
            off = dy * Wu + dx
            p2_s[:, t * Ch:(t + 1) * Ch] = h1_s[off:off + M2, :]
        h2 = jnp.dot(p2_s[...], w2_ref[...], preferred_element_type=f32)
        h2 = jnp.maximum(h2 + b2_ref[...], 0.0)

        # rows >= M2 only correspond to windows wrapping the W/H border; the wrapper
        # never reads them, so just zero-fill for determinism.
        o_ref[0:M2, :] = h2.astype(o_ref.dtype)
        o_ref[M2:npix, :] = jnp.zeros((npix - M2, Ch), o_ref.dtype)

    vmem = pltpu.MemorySpace.VMEM
    out_flat = pl.pallas_call(
        conv_kernel,
        out_shape=jax.ShapeDtypeStruct((B * npix, Ch), jnp.float32),
        grid_spec=pltpu.PrefetchScalarGridSpec(
            num_scalar_prefetch=0,
            grid=(B,),
            in_specs=[
                pl.BlockSpec((npix, C), lambda b: (b, 0)),    # upsampled x (pixel rows)
                pl.BlockSpec((npix, Ch), lambda b: (b, 0)),   # cropped skip connection
                pl.BlockSpec(memory_space=vmem),              # w3  (C, Ch)   resident once
                pl.BlockSpec(memory_space=vmem),              # b3  (1, Ch)
                pl.BlockSpec(memory_space=vmem),              # w1  (9C, Ch)
                pl.BlockSpec(memory_space=vmem),              # b1  (1, Ch)
                pl.BlockSpec(memory_space=vmem),              # w2  (9Ch, Ch)
                pl.BlockSpec(memory_space=vmem),              # b2  (1, Ch)
            ],
            out_specs=pl.BlockSpec((npix, Ch), lambda b: (b, 0)),
            scratch_shapes=[
                pltpu.VMEM((npix, C), compute_dtype),         # concat(cc, conv3(xu))
                pltpu.VMEM((M1, 9 * C), compute_dtype),       # conv1 im2col patches
                pltpu.VMEM((M1, Ch), compute_dtype),          # conv1 output
                pltpu.VMEM((M2, 9 * Ch), compute_dtype),      # conv2 im2col patches
            ],
        ),
        compiler_params=pltpu.CompilerParams(
            dimension_semantics=("parallel",)),
    )(xu_pix, cc_pix, w3m, b3r, w1m, b1r, w2m, b2r)

    # (B*Hu*Wu, Ch) pixel rows -> NCHW, keeping only the VALID conv output pixels
    out = (out_flat.reshape(B, Hu, Wu, Ch)[:, :H2, :W2, :]
                   .transpose(0, 3, 1, 2))
    # TODO(synk): the module's debug `print(x.size())` side-effect is omitted.
    return out


# ----------------------------------------------------------------------------
# Pure-JAX reference (f32, HIGHEST precision) for the correctness check
# ----------------------------------------------------------------------------
def reference_forward(x, cc, w1, b1, w2, b2, w3, b3):
    B, C, Hi, Wi = x.shape
    Hu, Wu = 2 * Hi, 2 * Wi
    AH = jnp.asarray(bilinear_matrix(Hu, Hi))
    AW = jnp.asarray(bilinear_matrix(Wu, Wi))
    xu = jnp.einsum('hp,wq,bcpq->bchw', AH, AW, x,
                    precision=jax.lax.Precision.HIGHEST)
    dn = ('NCHW', 'OIHW', 'NCHW')

    def conv(a, w):
        return jax.lax.conv_general_dilated(a, w, (1, 1), 'VALID',
                                            dimension_numbers=dn,
                                            precision=jax.lax.Precision.HIGHEST)

    y3 = conv(xu, w3) + b3[None, :, None, None]
    mid = cc.shape[2] // 2
    lo = mid - Hu // 2
    hi = lo + Hu
    crop = cc[:, :, lo:hi, lo:hi]
    z = jnp.concatenate([crop, y3], axis=1)
    h1 = jax.nn.relu(conv(z, w1) + b1[None, :, None, None])
    h2 = jax.nn.relu(conv(h1, w2) + b2[None, :, None, None])
    return h2


# ----------------------------------------------------------------------------
if __name__ == "__main__":
    key = jax.random.PRNGKey(0)
    ks = jax.random.split(key, 8)

    B, C, Hi, Wi = 2, 4, 8, 8          # in_channels=4  -> upsampled 16x16
    Ch = C // 2
    Hcc = Wcc = 2 * Hi + 4             # skip-connection feature map (20x20)

    x = jax.random.normal(ks[0], (B, C, Hi, Wi), jnp.float32)
    cc = jax.random.normal(ks[1], (B, Ch, Hcc, Wcc), jnp.float32)

    # deterministic parameters (shapes follow Expanding_Block.__init__)
    w1 = 0.1 * jax.random.normal(ks[2], (Ch, C, 3, 3), jnp.float32)    # conv1
    b1 = 0.1 * jax.random.normal(ks[3], (Ch,), jnp.float32)
    w2 = 0.1 * jax.random.normal(ks[4], (Ch, Ch, 3, 3), jnp.float32)   # conv2
    b2 = 0.1 * jax.random.normal(ks[5], (Ch,), jnp.float32)
    w3 = 0.1 * jax.random.normal(ks[6], (Ch, C, 1, 1), jnp.float32)    # conv3
    b3 = 0.1 * jax.random.normal(ks[7], (Ch,), jnp.float32)

    out = expanding_block_pallas(x, cc, w1, b1, w2, b2, w3, b3)
    jax.block_until_ready(out)

    ref = reference_forward(x, cc, w1, b1, w2, b2, w3, b3)
    assert out.shape == (B, Ch, 2 * Hi - 4, 2 * Wi - 4), out.shape
    # bf16 matmul operands with f32 accumulation -> verified at 2e-2
    np.testing.assert_allclose(np.asarray(out), np.asarray(ref),
                               rtol=2e-2, atol=2e-2)

    print("KERNEL_OK")
</pallas_src>

<mosaic_0001>
module attributes {stable_mosaic.version = 11 : i64} {
  func.func @_upsample_kernel(%arg0: memref<16x32xbf16, #tpu.memory_space<vmem>>, %arg1: memref<32x16xbf16, #tpu.memory_space<vmem>>, %arg2: memref<32x64xbf16, #tpu.memory_space<vmem>>, %arg3: memref<32x64xbf16, #tpu.memory_space<vmem>>) attributes {dimension_semantics = [], scalar_prefetch = 0 : i64, scratch_operands = 0 : i64, tpu.core_type = #tpu.core_type<tc>} {
    %c0 = arith.constant 0 : index
    %c0_0 = arith.constant 0 : index
    %0 = vector.load %arg1[%c0, %c0_0] : memref<32x16xbf16, #tpu.memory_space<vmem>>, vector<32x16xbf16>
    %c0_1 = arith.constant 0 : index
    %c0_2 = arith.constant 0 : index
    %1 = vector.load %arg0[%c0_1, %c0_2] : memref<16x32xbf16, #tpu.memory_space<vmem>>, vector<16x32xbf16>
    %cst = arith.constant dense<0.000000e+00> : vector<32x32xf32>
    %2 = tpu.matmul %0, %1, %cst {dimension_numbers = #tpu.dot_dimension_numbers<[1], [0], [0], [1], [0, 0, 1, 1], [], []>} : vector<32x16xbf16>, vector<16x32xbf16>, vector<32x32xf32> -> vector<32x32xf32>
    %3 = arith.truncf %2 : vector<32x32xf32> to vector<32x32xbf16>
    %c0_3 = arith.constant 0 : index
    %c0_4 = arith.constant 0 : index
    %4 = vector.load %arg2[%c0_3, %c0_4] : memref<32x64xbf16, #tpu.memory_space<vmem>>, vector<32x64xbf16>
    %cst_5 = arith.constant dense<0.000000e+00> : vector<32x64xf32>
    %5 = tpu.matmul %3, %4, %cst_5 {dimension_numbers = #tpu.dot_dimension_numbers<[1], [0], [0], [1], [0, 0, 1, 1], [], []>} : vector<32x32xbf16>, vector<32x64xbf16>, vector<32x64xf32> -> vector<32x64xf32>
    %6 = arith.truncf %5 : vector<32x64xf32> to vector<32x64xbf16>
    %c0_6 = arith.constant 0 : index
    %c0_7 = arith.constant 0 : index
    %7 = vector.load %arg3[%c0_6, %c0_7] : memref<32x64xbf16, #tpu.memory_space<vmem>>, vector<32x64xbf16>
    tpu.vector_store %arg3[%c0_6, %c0_7], %6 {strides = array<i32>} : memref<32x64xbf16, #tpu.memory_space<vmem>>, vector<32x64xbf16>,
    return
  }
}

</mosaic_0001>

<bundles_post_ra>
// kernel: tpu_custom_call.1
= control target key start
LH: loop header
LB: loop body
LE: loop exit
PB: predicated region body
PF: predicated region fallthrough
CT: control target
= control target key end

     0   :  { %vm38_vm0 = vcmask 130048   ;;  %s325_s0 = inlined_call_operand.vmem [shape: bf16[16,32], index: 0, kind: input, shape index: {}]   ;;  %s326_s1 = inlined_call_operand.vmem [shape: bf16[32,16], index: 1, kind: input, shape index: {}]   ;;  %s327_s2 = inlined_call_operand.vmem [shape: bf16[32,64], index: 2, kind: input, shape index: {}]   ;;  %s328_s3 = inlined_call_operand.hbm [shape: bf16[32,64], index: 3, kind: output, shape index: {}]  }
   0x1   :  { %v246_v0 = vld [vmem:[%s325_s0] sm:$0xff]   ;;  %v248_v2 = vld [vmem:[%s326_s1 + $0x8] sm:$0xff]  }
   0x2   :  { %v247_v1 = vld [vmem:[%s326_s1] sm:$0xff]   ;;  %229 = vmatprep.subr.bf16.mxu0 %v246_v0 }
   0x3   :  { %230 = vmatpush3.bf16.msra.mxu0 %v246_v0  ;;  %231 = vmatprep.mubr.msk.bf16.mxu0 %vm38_vm0, %v247_v1  ;;  %v249_v3 = vld [vmem:[%s327_s2] sm:$0xff]  }
   0x4   :  { %8 = vsyncpa [#allocation3], 0  ;;  %235 = vmatprep.subr.bf16.mxu1 %v249_v3  ;;  %v250_v4 = vld [vmem:[%s327_s2 + $0x8] sm:$0xff]   ;;  %vm112_vm1 = vcmask 261120   ;;  %vm184_vm2 = vcmask 519168   ;;  %s275_s1 = smov [#allocation2]  }
   0x5   :  { %236 = vmatpush3.bf16.msra.mxu1 %v249_v3  ;;  %s194_s21 = sshll.u32 %s275_s1, 4  ;;  %s195_s21 = int_to_ptr.vmem [resolvable:$true] %s194_s21 }
   0x6   :  { %232 = vmatmul.mubr.msk.bf16.vlgmr.msra.gmra.mrb[0].mxu0 %vm38_vm0, %v248_v2  ;;  %237 = vmatprep.subr.bf16.mxu1 %v250_v4  ;;  %s251_s2 = scalar_lea.vmem %s195_s21, 256  ;;  %p256_p1 = scmp.lt.s32.totalorder %s195_s21, %s195_s21 }
   0x7   :  { %p252_p0 = scmp.ne.s32.totalorder %s195_s21, %s251_s2  ;;  %p257_p2 = scmp.lt.s32.totalorder %s251_s2, %s251_s2 }
   0x9   :  { %238 = vmatpush3.bf16.msra.mxu1 %v250_v4  ;;  %p258_p3 = por %p257_p2, %p256_p1 }
   0xb   :  { %p259_p4 = pnand %p258_p3, %p252_p0 }
  0xd9   :  { %v233_v5 = vpop.f32.mrb[0].mxu0 }
  0xda   :  { %v79_v6 = vpop.f32.mrb[1].mxu0 }
  0xdb   :  { %v234_v7 = vpop.f32.mrb[2].mxu0 }
  0xdc   :  { %v95_v8 = vpack.c.bf16 %v234_v7, %v233_v5  ;;  %v82_v9 = vpop.f32.mrb[3].mxu0 }
  0xdd   :  { %v94_v10 = vpack.c.bf16 %v82_v9, %v79_v6 }
  0xdf   :  { %239 = vmatprep.mubr.msk.bf16.mxu1 %vm112_vm1, %v94_v10 }
  0xe0   :  { %240 = vmatmul.mubr.msk.bf16.vlgmr.msra.gmra.mrb[0].mxu1 %vm112_vm1, %v95_v8 }
 0x1b3   :  { %v241_v11 = vpop.f32.mrb[0].mxu1 }
 0x1b4   :  { %v220_v12 = vpack.c.bf16 %v241_v11, %v241_v11  ;;  %v153_v13 = vpop.f32.mrb[1].mxu1 }
 0x1b5   :  { %v218_v14 = vpack.c.bf16 %v153_v13, %v153_v13  ;;  %v242_v15 = vpop.f32.mrb[2].mxu1 }
 0x1b6   :  { %187 = vst.msk [vmem:[#allocation2 + $0x8] sm:$0xf] %vm184_vm2, %v220_v12  ;;  %v221_v16 = vpack.c.bf16 %v242_v15, %v242_v15  ;;  %v156_v17 = vpop.f32.mrb[3].mxu1 }
 0x1b7   :  { %185 = vst.msk [vmem:[#allocation2] sm:$0xf] %vm184_vm2, %v218_v14  ;;  %v219_v18 = vpack.c.bf16 %v156_v17, %v156_v17 }
 0x1b8   :  { %188 = vst.msk [vmem:[#allocation2 + $0xc] sm:$0xf] %vm184_vm2, %v221_v16 }
 0x1b9   :  { %186 = vst.msk [vmem:[#allocation2 + $0x4] sm:$0xf] %vm184_vm2, %v219_v18 }
 0x1ba   :  { %262 = shalt.err (!%p259_p4)
}
 0x1bb   :  { %s263_s24 = scalar_lea.hbm %s328_s3, 256 }
 0x1bc   :  { %p264_p5 = scmp.ne.s32.totalorder %s328_s3, %s263_s24  ;;  %p267_p6 = scmp.lt.u32.totalorder %s263_s24, %s328_s3 }
 0x1be   :  { %p269_p7 = pnand %p267_p6, %p264_p5 }
 0x1c0   :  { %272 = shalt.err (!%p269_p7)
}
 0x1c1   :  { %s276_s29 = smov 64   ;;  %s277_s30 = smov 4  }
 0x1c2   :  { %200 = dma.vmem_to_hbm [thread:$0]  %s195_s21, 256, %s328_s3, [#allocation3], %s276_s29, %s276_s29, %s277_s30  }
 0x1c3   :  { %273 = dma.done.wait [#allocation3], 256  }
 0x1c4   :  { %274 = vsyncadd [#allocation3], 4294967040 }
 0x1c5   :  { %204 = vsyncpa [#allocation3], 1 }

</bundles_post_ra>
